<compile_context>
chip_gen: v7x
topology: tpu7x:2x2x1
jax: 0.10.0
libtpu: 0.0.40
codegen_flags: <defaults>
</compile_context>

<pallas_src>
import jax
import jax.numpy as jnp
from jax.experimental import pallas as pl
from jax.experimental.pallas import tpu as pltpu


def flatten_copy_kernel(x_ref, o_ref):
    """Identity copy of one tile of the flattened tensor."""
    o_ref[...] = x_ref[...]


def _sublane_align(itemsize):
    """Native sublane packing: (8,128) f32, (16,128) bf16/f16, (32,128) int8/fp8."""
    if itemsize >= 4:
        return 8
    if itemsize == 2:
        return 16
    return 32


def _chip_config():
    """Per-generation (block budget bytes, vmem_limit_bytes, has two TensorCores)."""
    try:
        vmem_cap = getattr(pltpu.get_tpu_info(), "vmem_capacity_bytes", None)
    except Exception:
        vmem_cap = None
    if vmem_cap is not None and vmem_cap <= (64 << 20):
        # v7x: 64 MiB VMEM, 2 TensorCores -> smaller blocks, feed both cores.
        return (4 << 20), (48 << 20), True
    if vmem_cap is None:
        # Unknown chip: conservative settings that are safe everywhere.
        return (4 << 20), (48 << 20), False
    # v5e / v6e: 128 MiB physical VMEM, single TensorCore -> big blocks.
    return (8 << 20), (64 << 20), False


def _pick_stream_lane_width(total, budget_elems, sub):
    """Largest multiple-of-128 lane width dividing `total` (prefer >= sub rows).

    Returns None when no multiple of 128 divides the flat size (fallback path).
    """
    cap = min(budget_elems, 65536)
    best_pref = None   # largest L whose row count total // L is >= sub
    best_any = None
    cand = 128
    while cand <= cap:
        if total % cand == 0:
            best_any = cand
            if total // cand >= sub:
                best_pref = cand
        cand += 128
    return best_pref if best_pref is not None else best_any


def _pick_tiles_2d(B, N, sub, budget_elems, two_tc):
    """Row/column tiles for the (B, N) fallback path."""
    budget_elems = max(budget_elems, sub * 128)
    # Column tile: full width when it fits, else a lane-dense multiple of 128.
    tn = N if N <= budget_elems else max(128, ((budget_elems // sub) // 128) * 128)
    tb = max(1, min(B, budget_elems // max(tn, 1)))
    # Fix the tb < sublane pathology: shrink tn (kept a multiple of 128) so the
    # row tile reaches sublane alignment instead of emitting 1..7-row blocks.
    if tb < min(sub, B) and tn > 128:
        tn = max(128, ((budget_elems // sub) // 128) * 128)
        tb = max(1, min(B, budget_elems // tn))
    if tb < B:  # partial-batch tiles must be sublane aligned (full dim is OK)
        tb = tb - (tb % sub) if tb >= sub else min(B, sub)
    # Only force a >= 2-block parallel grid on chips with two TensorCores.
    if two_tc:
        while (pl.cdiv(B, tb) * pl.cdiv(N, tn)) < 2 and tb >= 2 * sub:
            tb //= 2
            tb -= tb % sub
    return tb, tn


def flatten(x, *, donate=False):
    """Pallas implementation of Flatten: x [B, ...] -> [B, prod(...)]."""
    B = int(x.shape[0])
    N = 1
    for d in x.shape[1:]:
        N *= int(d)
    total = B * N

    itemsize = jnp.dtype(x.dtype).itemsize
    sub = _sublane_align(itemsize)
    block_bytes, vmem_limit, two_tc = _chip_config()
    budget_elems = max(block_bytes // itemsize, sub * 128)
    aliases = {0: 0} if donate else {}

    # ---- Fast path: uniform 1-D lane-dense stream over the contiguous data.
    L = _pick_stream_lane_width(total, budget_elems, sub) if total > 0 else None
    if L is not None:
        R = total // L
        tr = min(R, max(1, budget_elems // L))
        if tr < R:
            tr = tr - (tr % sub) if tr >= sub else min(R, sub)
        if two_tc:
            while pl.cdiv(R, tr) < 2 and tr >= 2 * sub:
                tr //= 2
            if tr < R and tr % sub:
                tr -= tr % sub
        xs = x.reshape(R, L)  # metadata-only view of the contiguous buffer
        out = pl.pallas_call(
            flatten_copy_kernel,
            out_shape=jax.ShapeDtypeStruct((R, L), x.dtype),
            grid_spec=pltpu.PrefetchScalarGridSpec(
                num_scalar_prefetch=0,
                grid=(pl.cdiv(R, tr),),
                in_specs=[pl.BlockSpec((tr, L), lambda i: (i, 0))],
                out_specs=pl.BlockSpec((tr, L), lambda i: (i, 0)),
            ),
            compiler_params=pltpu.CompilerParams(
                dimension_semantics=("parallel",),
                vmem_limit_bytes=vmem_limit),
            input_output_aliases=aliases,
        )(xs)
        return out.reshape(B, N)

    # ---- Fallback: 2-D (B, N) tiling when the flat size is not 128-divisible.
    xf = x.reshape(B, N)
    tb, tn = _pick_tiles_2d(B, N, sub, budget_elems, two_tc)
    return pl.pallas_call(
        flatten_copy_kernel,
        out_shape=jax.ShapeDtypeStruct((B, N), x.dtype),
        grid_spec=pltpu.PrefetchScalarGridSpec(
            num_scalar_prefetch=0,
            grid=(pl.cdiv(B, tb), pl.cdiv(N, tn)),
            in_specs=[pl.BlockSpec((tb, tn), lambda i, j: (i, j))],
            out_specs=pl.BlockSpec((tb, tn), lambda i, j: (i, j)),
        ),
        compiler_params=pltpu.CompilerParams(
            dimension_semantics=("parallel", "parallel"),
            vmem_limit_bytes=vmem_limit),
        input_output_aliases=aliases,
    )(xf)


if __name__ == "__main__":
    key = jax.random.PRNGKey(0)

    # Primary test: exercises the lane-dense stream fast path (total % 128 == 0).
    B, C, H, W = 16, 4, 16, 16
    x = jax.random.normal(key, (B, C, H, W), jnp.float32)
    out = jax.block_until_ready(flatten(x))
    assert out.shape == (B, C * H * W), out.shape
    assert jnp.array_equal(out, x.reshape(B, -1))

    # Ragged shape: exercises the 2-D fallback tiler (total % 128 != 0).
    x2 = jax.random.normal(jax.random.PRNGKey(1), (4, 3, 5, 7), jnp.float32)
    out2 = jax.block_until_ready(flatten(x2))
    assert out2.shape == (4, 3 * 5 * 7)
    assert jnp.array_equal(out2, x2.reshape(4, -1))

    # Sub-32-bit dtype: exercises the dtype-aware (16,128) sublane alignment.
    x3 = jax.random.normal(jax.random.PRNGKey(2), (32, 8, 8, 8)).astype(jnp.bfloat16)
    out3 = jax.block_until_ready(flatten(x3))
    assert jnp.array_equal(out3, x3.reshape(32, -1))

    print("KERNEL_OK")
</pallas_src>

<mosaic_0001>
module attributes {stable_mosaic.version = 11 : i64} {
  func.func @flatten_copy_kernel(%arg0: i32, %arg1: memref<8x2048xf32, #tpu.memory_space<vmem>>, %arg2: memref<8x2048xf32, #tpu.memory_space<vmem>>) attributes {dimension_semantics = [#tpu.dimension_semantics<parallel>], iteration_bounds = array<i64: 1>, scalar_prefetch = 0 : i64, scratch_operands = 0 : i64, tpu.core_type = #tpu.core_type<tc>, window_params = [{transform_indices = @transform_0, window_bounds = array<i64: 8, 2048>}, {transform_indices = @transform_1, window_bounds = array<i64: 8, 2048>}]} {
    %c0 = arith.constant 0 : index
    %c0_0 = arith.constant 0 : index
    %0 = vector.load %arg1[%c0, %c0_0] : memref<8x2048xf32, #tpu.memory_space<vmem>>, vector<8x2048xf32>
    %c0_1 = arith.constant 0 : index
    %c0_2 = arith.constant 0 : index
    %1 = vector.load %arg2[%c0_1, %c0_2] : memref<8x2048xf32, #tpu.memory_space<vmem>>, vector<8x2048xf32>
    tpu.vector_store %arg2[%c0_1, %c0_2], %0 {strides = array<i32>} : memref<8x2048xf32, #tpu.memory_space<vmem>>, vector<8x2048xf32>,
    return
  }
  func.func @transform_0(%arg0: i32) -> (i32, i32) {
    %c0_i32 = arith.constant 0 : i32
    %c0_i32_0 = arith.constant 0 : i32
    return %arg0, %c0_i32 : i32, i32
  }
  func.func @transform_1(%arg0: i32) -> (i32, i32) {
    %c0_i32 = arith.constant 0 : i32
    %c0_i32_0 = arith.constant 0 : i32
    return %arg0, %c0_i32 : i32, i32
  }
}

</mosaic_0001>

<bundles_post_ra>
// kernel: tpu_custom_call.1
= control target key start
LH: loop header
LB: loop body
LE: loop exit
PB: predicated region body
PF: predicated region fallthrough
CT: control target
= control target key end

     0   :  { %6 = vsyncpa [#allocation3], 0  ;;  %s154_s0 = inlined_call_operand.hbm [shape: f32[8,2048], index: 0, kind: input, shape index: {}]   ;;  %s155_s1 = inlined_call_operand.hbm [shape: f32[8,2048], index: 1, kind: output, shape index: {}]  }
   0x1   :  { %7 = vsyncpa [#allocation4], 0  ;;  %s118_s6 = smov [#allocation2]   ;;  %s70_s10 = scalar_lea.hbm %s154_s0, 2048 }
   0x2   :  { %s14_s7 = sshll.u32 %s118_s6, 4  ;;  %p71_p0 = scmp.ne.s32.totalorder %s154_s0, %s70_s10  ;;  %s15_s7 = int_to_ptr.vmem [resolvable:$true] %s14_s7 }
   0x3   :  { %p74_p1 = scmp.lt.u32.totalorder %s70_s10, %s154_s0 }
   0x5   :  { %p76_p2 = pnand %p74_p1, %p71_p0 }
   0x7   :  { %79 = shalt.err (!%p76_p2)
}
   0x8   :  { %s80_s15 = scalar_lea.vmem %s15_s7, 2048  ;;  %p85_p4 = scmp.lt.s32.totalorder %s15_s7, %s15_s7 }
   0x9   :  { %p81_p3 = scmp.ne.s32.totalorder %s15_s7, %s80_s15  ;;  %p86_p5 = scmp.lt.s32.totalorder %s80_s15, %s80_s15 }
   0xb   :  { %p87_p6 = por %p86_p5, %p85_p4 }
   0xd   :  { %p88_p7 = pnand %p87_p6, %p81_p3 }
   0xf   :  { %91 = shalt.err (!%p88_p7)
}
  0x10   :  { %17 = dma.hbm_to_vmem [thread:$0]  %s154_s0, 2048, %s15_s7, [#allocation3]  }
  0x11   :  { %114 = dma.done.wait [#allocation3], 2048  }
  0x12   :  { %115 = vsyncadd [#allocation3], 4294965248  ;;  %v21_v0 = vld [vmem:[#allocation2] sm:$0xff]  ;;  %v22_v1 = vld [vmem:[#allocation2 + $0x8] sm:$0xff]  ;;  %s119_s18 = smov [#allocation5]  }
  0x13   :  { %v23_v2 = vld [vmem:[#allocation2 + $0x10] sm:$0xff]  ;;  %37 = vst [vmem:[#allocation5] sm:$0xff] %v21_v0  ;;  %38 = vst [vmem:[#allocation5 + $0x8] sm:$0xff] %v22_v1  ;;  %v24_v3 = vld [vmem:[#allocation2 + $0x18] sm:$0xff]  ;;  %s59_s19 = sshll.u32 %s119_s18, 4  ;;  %s60_s19 = int_to_ptr.vmem [resolvable:$true] %s59_s19 }
  0x14   :  { %39 = vst [vmem:[#allocation5 + $0x10] sm:$0xff] %v23_v2  ;;  %v25_v4 = vld [vmem:[#allocation2 + $0x20] sm:$0xff]  ;;  %v26_v5 = vld [vmem:[#allocation2 + $0x28] sm:$0xff]  ;;  %40 = vst [vmem:[#allocation5 + $0x18] sm:$0xff] %v24_v3  ;;  %s92_s0 = scalar_lea.vmem %s60_s19, 2048  ;;  %p97_p9 = scmp.lt.s32.totalorder %s60_s19, %s60_s19 }
  0x15   :  { %41 = vst [vmem:[#allocation5 + $0x20] sm:$0xff] %v25_v4  ;;  %42 = vst [vmem:[#allocation5 + $0x28] sm:$0xff] %v26_v5  ;;  %v27_v6 = vld [vmem:[#allocation2 + $0x30] sm:$0xff]  ;;  %v28_v7 = vld [vmem:[#allocation2 + $0x38] sm:$0xff]  ;;  %p93_p8 = scmp.ne.s32.totalorder %s60_s19, %s92_s0  ;;  %p98_p10 = scmp.lt.s32.totalorder %s92_s0, %s92_s0 }
  0x16   :  { %v29_v8 = vld [vmem:[#allocation2 + $0x40] sm:$0xff]  ;;  %43 = vst [vmem:[#allocation5 + $0x30] sm:$0xff] %v27_v6  ;;  %44 = vst [vmem:[#allocation5 + $0x38] sm:$0xff] %v28_v7  ;;  %v30_v9 = vld [vmem:[#allocation2 + $0x48] sm:$0xff] }
  0x17   :  { %45 = vst [vmem:[#allocation5 + $0x40] sm:$0xff] %v29_v8  ;;  %v31_v10 = vld [vmem:[#allocation2 + $0x50] sm:$0xff]  ;;  %v32_v11 = vld [vmem:[#allocation2 + $0x58] sm:$0xff]  ;;  %46 = vst [vmem:[#allocation5 + $0x48] sm:$0xff] %v30_v9  ;;  %p99_p11 = por %p98_p10, %p97_p9 }
  0x18   :  { %47 = vst [vmem:[#allocation5 + $0x50] sm:$0xff] %v31_v10  ;;  %48 = vst [vmem:[#allocation5 + $0x58] sm:$0xff] %v32_v11  ;;  %v33_v12 = vld [vmem:[#allocation2 + $0x60] sm:$0xff]  ;;  %v34_v13 = vld [vmem:[#allocation2 + $0x68] sm:$0xff] }
  0x19   :  { %v35_v14 = vld [vmem:[#allocation2 + $0x70] sm:$0xff]  ;;  %49 = vst [vmem:[#allocation5 + $0x60] sm:$0xff] %v33_v12  ;;  %50 = vst [vmem:[#allocation5 + $0x68] sm:$0xff] %v34_v13  ;;  %v36_v15 = vld [vmem:[#allocation2 + $0x78] sm:$0xff]  ;;  %p100_p12 = pnand %p99_p11, %p93_p8 }
  0x1a   :  { %51 = vst [vmem:[#allocation5 + $0x70] sm:$0xff] %v35_v14  ;;  %52 = vst [vmem:[#allocation5 + $0x78] sm:$0xff] %v36_v15 }
  0x1b   :  { %103 = shalt.err (!%p100_p12)
}
  0x1c   :  { %s104_s22 = scalar_lea.hbm %s155_s1, 2048 }
  0x1d   :  { %p105_p13 = scmp.ne.s32.totalorder %s155_s1, %s104_s22  ;;  %p108_p0 = scmp.lt.u32.totalorder %s104_s22, %s155_s1 }
  0x1f   :  { %p110_p1 = pnand %p108_p0, %p105_p13 }
  0x21   :  { %113 = shalt.err (!%p110_p1)
}
  0x22   :  { %62 = dma.vmem_to_hbm [thread:$0]  %s60_s19, 2048, %s155_s1, [#allocation4]  }
  0x23   :  { %116 = dma.done.wait [#allocation4], 2048  }
  0x24   :  { %117 = vsyncadd [#allocation4], 4294965248 }
  0x25   :  { %66 = vsyncpa [#allocation3], 1 }
  0x26   :  { %67 = vsyncpa [#allocation4], 1 }

</bundles_post_ra>
